<compile_context>
chip_gen: v6e
topology: v6e:2x2x1
jax: 0.10.0
libtpu: 0.0.40
codegen_flags: <defaults>
</compile_context>

<pallas_src>
import functools

import numpy as np
import jax
import jax.numpy as jnp
from jax.experimental import pallas as pl
from jax.experimental.pallas import tpu as pltpu


def _focal_kernel(x_ref, t_ref, out_ref, *, gamma, alpha, C, S, ts):
    """x_ref: (1, C, ts, 128) logits (native dtype); t_ref: (1, 1, ts, 128) int32
    targets; out_ref: (1, 1, pr, 128) f32 per-block partial loss sums."""
    j = pl.program_id(1)

    t = t_ref[0, 0]                                    # (ts, 128) int32

    # ---- pass 1: running max over classes (VPU maxes, one class slice live)
    m = x_ref[0, 0].astype(jnp.float32)
    for c in range(1, C):
        m = jnp.maximum(m, x_ref[0, c].astype(jnp.float32))

    # ---- pass 2: sum of exp + one-hot gather of z_t / exp(z_t) / alpha_t
    s = jnp.zeros((ts, 128), jnp.float32)
    z_t = jnp.zeros((ts, 128), jnp.float32)
    ez_t = jnp.zeros((ts, 128), jnp.float32)
    a_t = jnp.zeros((ts, 128), jnp.float32)
    for c in range(C):
        z = x_ref[0, c].astype(jnp.float32) - m
        ez = jnp.exp(z)
        s = s + ez
        sel = t == c
        z_t = jnp.where(sel, z, z_t)
        ez_t = jnp.where(sel, ez, ez_t)
        a_t = jnp.where(sel, alpha[c], a_t)

    # log_softmax gather done on z (not logp): logpt = z_t - log(sum exp z)
    logpt = (z_t - jnp.log(s)) * a_t
    # pt from the already-available exp(z) terms -- no second exp
    pt = ez_t / s

    # (1 - pt) ** gamma: integer gamma -> repeated VPU multiplies (start at u)
    u = 1.0 - pt
    g = float(gamma)
    if g == int(g) and 0 <= int(g) <= 8:
        gi = int(g)
        if gi == 0:
            focal = jnp.ones_like(u)
        else:
            focal = u
            for _ in range(gi - 1):
                focal = focal * u
    else:
        focal = jnp.power(u, g)

    loss = -focal * logpt                              # (ts, 128)

    # mask the spatial tail when S is not a multiple of ts (partial last block)
    if S % ts != 0:
        rows = jax.lax.broadcasted_iota(jnp.int32, (ts, 128), 0)
        loss = jnp.where(j * ts + rows < S, loss, 0.0)

    # tree of VPU adds down to a tiny (<=8, 128) partial; writeback negligible
    if ts % 8 == 0:
        partial = jnp.sum(loss.reshape(ts // 8, 8, 128), axis=0)
    else:
        partial = loss                                 # ts == S < 8 rows: keep as-is
    out_ref[0, 0] = partial


def _normalize_alpha(alpha, C):
    """Mirror the module's __init__ alpha handling; return compile-time floats."""
    if alpha is None:
        return tuple(1.0 for _ in range(C))
    if isinstance(alpha, (float, int)) and not isinstance(alpha, bool):
        vals = (float(alpha), 1.0 - float(alpha))
    else:
        vals = tuple(float(v) for v in np.asarray(alpha).reshape(-1))
    assert len(vals) == C, "alpha must provide one weight per class"
    return vals


def _vmem_capacity_bytes():
    try:
        info = pltpu.get_tpu_info()
        cap = getattr(info, "vmem_capacity_bytes", None)
        if cap:
            return int(cap)
    except Exception:
        pass
    return 64 * 1024 * 1024          # conservative (v7x-sized) fallback


def _pick_spatial_tile(S, C, x_itemsize, vmem_budget_bytes):
    """Largest spatial tile (128-lane rows) whose full footprint -- IO double
    buffers AND in-kernel f32 temporaries -- fits the VMEM budget."""
    per_row = 128 * (2 * C * x_itemsize   # logits block, double-buffered
                     + 2 * 4              # int32 target block, double-buffered
                     + (C + 12) * 4)      # f32 temporaries (casts + running values)
    ts_max = max(1, int(vmem_budget_bytes // per_row))
    if S <= max(ts_max, 8):
        return S, per_row                 # full spatial extent in one block (legal)
    return max(8, (ts_max // 8) * 8), per_row


def focal_loss(x, target, alpha=None, gamma=0.0, size_average=True,
               vmem_budget_bytes=None):
    """x: (N, C, H, W) logits (native dtype); target: (N, H, W) integer class ids;
    alpha: None | float | list/array of per-class weights.  Returns scalar f32."""
    N, C, H, W = x.shape
    HW = H * W
    assert HW % 128 == 0, "H*W must be a multiple of 128"
    # TODO(synk): lane-mask the last 128-lane group to support H*W % 128 != 0.
    S = HW // 128
    M = N * HW

    phys = _vmem_capacity_bytes()
    if vmem_budget_bytes is None:
        # honest per-generation budget: half of physical minus DMA/scratch headroom,
        # capped so v5e/v6e don't over-commit either.
        vmem_budget_bytes = min(phys // 2 - 8 * 1024 * 1024, 48 * 1024 * 1024)
        vmem_budget_bytes = max(vmem_budget_bytes, 8 * 1024 * 1024)

    ts, per_row = _pick_spatial_tile(S, C, jnp.dtype(x.dtype).itemsize,
                                     vmem_budget_bytes)
    nchunks = pl.cdiv(S, ts)
    pr = 8 if ts % 8 == 0 else ts          # rows of the per-block partial output

    # scoped-VMEM limit derived from the computed footprint, capped per chip
    vmem_limit = int(min(phys * 3 // 4,
                         max(ts * per_row + 16 * 1024 * 1024, 32 * 1024 * 1024)))

    # Pure reshapes (no transpose, no dtype cast) -> no extra HBM pass before the
    # kernel; the f32 cast happens on the VPU inside the kernel.
    x4 = x.reshape(N, C, S, 128)
    t4 = target.astype(jnp.int32).reshape(N, 1, S, 128)

    alpha_vals = _normalize_alpha(alpha, C)

    kernel = functools.partial(_focal_kernel, gamma=float(gamma),
                               alpha=alpha_vals, C=C, S=S, ts=ts)

    partials = pl.pallas_call(
        kernel,
        out_shape=jax.ShapeDtypeStruct((N, nchunks, pr, 128), jnp.float32),
        grid_spec=pltpu.PrefetchScalarGridSpec(
            num_scalar_prefetch=0,
            grid=(N, nchunks),
            in_specs=[
                pl.BlockSpec((1, C, ts, 128), lambda n, j: (n, 0, j, 0)),  # logits
                pl.BlockSpec((1, 1, ts, 128), lambda n, j: (n, 0, j, 0)),  # targets
            ],
            out_specs=pl.BlockSpec((1, 1, pr, 128), lambda n, j: (n, j, 0, 0)),
        ),
        compiler_params=pltpu.CompilerParams(
            # no cross-iteration state -> both axes shardable across TensorCores
            dimension_semantics=("parallel", "parallel"),
            vmem_limit_bytes=vmem_limit,
        ),
    )(x4, t4)

    total = jnp.sum(partials)              # tiny final reduction outside the kernel
    if size_average:
        total = total / jnp.float32(M)
    return total


def focal_loss_ref(x, target, alpha, gamma=0.0, size_average=True):
    # pure-JAX reference for sanity check (mirrors the PyTorch forward)
    N, C, H, W = x.shape
    x2 = jnp.transpose(x, (0, 2, 3, 1)).reshape(-1, C).astype(jnp.float32)
    t = target.reshape(-1).astype(jnp.int32)
    logp = jax.nn.log_softmax(x2, axis=-1)
    logpt = jnp.take_along_axis(logp, t[:, None], axis=1)[:, 0]
    pt = jnp.exp(logpt)
    at = jnp.asarray(_normalize_alpha(alpha, C), jnp.float32)[t]
    logpt = logpt * at
    loss = -1.0 * (1.0 - pt) ** gamma * logpt
    return loss.mean() if size_average else loss.sum()


if __name__ == "__main__":
    key = jax.random.PRNGKey(0)
    k1, k2 = jax.random.split(key)

    N, C, H, W = 2, 4, 16, 16
    gamma = 2.0
    alpha = [0.25, 0.75, 0.5, 0.5]        # list-alpha init path of the module

    x = jax.random.normal(k1, (N, C, H, W), jnp.float32)
    target = jax.random.randint(k2, (N, H, W), 0, C, jnp.int32)

    out = focal_loss(x, target, alpha, gamma=gamma, size_average=True)
    out = jax.block_until_ready(out)

    ref = focal_loss_ref(x, target, alpha, gamma=gamma, size_average=True)
    assert jnp.allclose(out, ref, rtol=1e-4, atol=1e-6), (out, ref)

    print("KERNEL_OK")
</pallas_src>

<mosaic_0001>
module attributes {stable_mosaic.version = 11 : i64} {
  func.func @_focal_kernel(%arg0: i32, %arg1: i32, %arg2: memref<1x4x2x128xf32, #tpu.memory_space<vmem>>, %arg3: memref<1x1x2x128xi32, #tpu.memory_space<vmem>>, %arg4: memref<1x1x2x128xf32, #tpu.memory_space<vmem>>) attributes {dimension_semantics = [#tpu.dimension_semantics<parallel>, #tpu.dimension_semantics<parallel>], iteration_bounds = array<i64: 2, 1>, scalar_prefetch = 0 : i64, scratch_operands = 0 : i64, tpu.core_type = #tpu.core_type<tc>, window_params = [{transform_indices = @transform_0, window_bounds = array<i64: 1, 4, 2, 128>}, {transform_indices = @transform_1, window_bounds = array<i64: 1, 1, 2, 128>}, {transform_indices = @transform_2, window_bounds = array<i64: 1, 1, 2, 128>}]} {
    %c0 = arith.constant 0 : index
    %c0_0 = arith.constant 0 : index
    %c0_1 = arith.constant 0 : index
    %c0_2 = arith.constant 0 : index
    %0 = vector.load %arg3[%c0, %c0_0, %c0_1, %c0_2] : memref<1x1x2x128xi32, #tpu.memory_space<vmem>>, vector<1x1x2x128xi32>
    %1 = vector.shape_cast %0 : vector<1x1x2x128xi32> to vector<2x128xi32>
    %c0_3 = arith.constant 0 : index
    %c0_4 = arith.constant 0 : index
    %c0_5 = arith.constant 0 : index
    %c0_6 = arith.constant 0 : index
    %2 = vector.load %arg2[%c0_3, %c0_4, %c0_5, %c0_6] : memref<1x4x2x128xf32, #tpu.memory_space<vmem>>, vector<1x1x2x128xf32>
    %3 = vector.shape_cast %2 : vector<1x1x2x128xf32> to vector<2x128xf32>
    %c0_7 = arith.constant 0 : index
    %c1 = arith.constant 1 : index
    %c0_8 = arith.constant 0 : index
    %c0_9 = arith.constant 0 : index
    %4 = vector.load %arg2[%c0_7, %c1, %c0_8, %c0_9] : memref<1x4x2x128xf32, #tpu.memory_space<vmem>>, vector<1x1x2x128xf32>
    %5 = vector.shape_cast %4 : vector<1x1x2x128xf32> to vector<2x128xf32>
    %6 = arith.maximumf %3, %5 : vector<2x128xf32>
    %c0_10 = arith.constant 0 : index
    %c2 = arith.constant 2 : index
    %c0_11 = arith.constant 0 : index
    %c0_12 = arith.constant 0 : index
    %7 = vector.load %arg2[%c0_10, %c2, %c0_11, %c0_12] : memref<1x4x2x128xf32, #tpu.memory_space<vmem>>, vector<1x1x2x128xf32>
    %8 = vector.shape_cast %7 : vector<1x1x2x128xf32> to vector<2x128xf32>
    %9 = arith.maximumf %6, %8 : vector<2x128xf32>
    %c0_13 = arith.constant 0 : index
    %c3 = arith.constant 3 : index
    %c0_14 = arith.constant 0 : index
    %c0_15 = arith.constant 0 : index
    %10 = vector.load %arg2[%c0_13, %c3, %c0_14, %c0_15] : memref<1x4x2x128xf32, #tpu.memory_space<vmem>>, vector<1x1x2x128xf32>
    %11 = vector.shape_cast %10 : vector<1x1x2x128xf32> to vector<2x128xf32>
    %12 = arith.maximumf %9, %11 : vector<2x128xf32>
    %cst = arith.constant 0.000000e+00 : f32
    %13 = vector.broadcast %cst : f32 to vector<2x128xf32>
    %cst_16 = arith.constant 0.000000e+00 : f32
    %14 = vector.broadcast %cst_16 : f32 to vector<2x128xf32>
    %cst_17 = arith.constant 0.000000e+00 : f32
    %15 = vector.broadcast %cst_17 : f32 to vector<2x128xf32>
    %cst_18 = arith.constant 0.000000e+00 : f32
    %16 = vector.broadcast %cst_18 : f32 to vector<2x128xf32>
    %c0_19 = arith.constant 0 : index
    %c0_20 = arith.constant 0 : index
    %c0_21 = arith.constant 0 : index
    %c0_22 = arith.constant 0 : index
    %17 = vector.load %arg2[%c0_19, %c0_20, %c0_21, %c0_22] : memref<1x4x2x128xf32, #tpu.memory_space<vmem>>, vector<1x1x2x128xf32>
    %18 = vector.shape_cast %17 : vector<1x1x2x128xf32> to vector<2x128xf32>
    %19 = arith.subf %18, %12 : vector<2x128xf32>
    %20 = math.exp %19 : vector<2x128xf32>
    %21 = arith.addf %13, %20 : vector<2x128xf32>
    %c0_i32 = arith.constant 0 : i32
    %22 = vector.broadcast %c0_i32 : i32 to vector<2x128xi32>
    %23 = arith.cmpi eq, %1, %22 : vector<2x128xi32>
    %24 = arith.select %23, %19, %14 : vector<2x128xi1>, vector<2x128xf32>
    %25 = arith.select %23, %20, %15 : vector<2x128xi1>, vector<2x128xf32>
    %cst_23 = arith.constant 2.500000e-01 : f32
    %26 = vector.broadcast %cst_23 : f32 to vector<2x128xf32>
    %27 = arith.select %23, %26, %16 : vector<2x128xi1>, vector<2x128xf32>
    %c0_24 = arith.constant 0 : index
    %c1_25 = arith.constant 1 : index
    %c0_26 = arith.constant 0 : index
    %c0_27 = arith.constant 0 : index
    %28 = vector.load %arg2[%c0_24, %c1_25, %c0_26, %c0_27] : memref<1x4x2x128xf32, #tpu.memory_space<vmem>>, vector<1x1x2x128xf32>
    %29 = vector.shape_cast %28 : vector<1x1x2x128xf32> to vector<2x128xf32>
    %30 = arith.subf %29, %12 : vector<2x128xf32>
    %31 = math.exp %30 : vector<2x128xf32>
    %32 = arith.addf %21, %31 : vector<2x128xf32>
    %c1_i32 = arith.constant 1 : i32
    %33 = vector.broadcast %c1_i32 : i32 to vector<2x128xi32>
    %34 = arith.cmpi eq, %1, %33 : vector<2x128xi32>
    %35 = arith.select %34, %30, %24 : vector<2x128xi1>, vector<2x128xf32>
    %36 = arith.select %34, %31, %25 : vector<2x128xi1>, vector<2x128xf32>
    %cst_28 = arith.constant 7.500000e-01 : f32
    %37 = vector.broadcast %cst_28 : f32 to vector<2x128xf32>
    %38 = arith.select %34, %37, %27 : vector<2x128xi1>, vector<2x128xf32>
    %c0_29 = arith.constant 0 : index
    %c2_30 = arith.constant 2 : index
    %c0_31 = arith.constant 0 : index
    %c0_32 = arith.constant 0 : index
    %39 = vector.load %arg2[%c0_29, %c2_30, %c0_31, %c0_32] : memref<1x4x2x128xf32, #tpu.memory_space<vmem>>, vector<1x1x2x128xf32>
    %40 = vector.shape_cast %39 : vector<1x1x2x128xf32> to vector<2x128xf32>
    %41 = arith.subf %40, %12 : vector<2x128xf32>
    %42 = math.exp %41 : vector<2x128xf32>
    %43 = arith.addf %32, %42 : vector<2x128xf32>
    %c2_i32 = arith.constant 2 : i32
    %44 = vector.broadcast %c2_i32 : i32 to vector<2x128xi32>
    %45 = arith.cmpi eq, %1, %44 : vector<2x128xi32>
    %46 = arith.select %45, %41, %35 : vector<2x128xi1>, vector<2x128xf32>
    %47 = arith.select %45, %42, %36 : vector<2x128xi1>, vector<2x128xf32>
    %cst_33 = arith.constant 5.000000e-01 : f32
    %48 = vector.broadcast %cst_33 : f32 to vector<2x128xf32>
    %49 = arith.select %45, %48, %38 : vector<2x128xi1>, vector<2x128xf32>
    %c0_34 = arith.constant 0 : index
    %c3_35 = arith.constant 3 : index
    %c0_36 = arith.constant 0 : index
    %c0_37 = arith.constant 0 : index
    %50 = vector.load %arg2[%c0_34, %c3_35, %c0_36, %c0_37] : memref<1x4x2x128xf32, #tpu.memory_space<vmem>>, vector<1x1x2x128xf32>
    %51 = vector.shape_cast %50 : vector<1x1x2x128xf32> to vector<2x128xf32>
    %52 = arith.subf %51, %12 : vector<2x128xf32>
    %53 = math.exp %52 : vector<2x128xf32>
    %54 = arith.addf %43, %53 : vector<2x128xf32>
    %c3_i32 = arith.constant 3 : i32
    %55 = vector.broadcast %c3_i32 : i32 to vector<2x128xi32>
    %56 = arith.cmpi eq, %1, %55 : vector<2x128xi32>
    %57 = arith.select %56, %52, %46 : vector<2x128xi1>, vector<2x128xf32>
    %58 = arith.select %56, %53, %47 : vector<2x128xi1>, vector<2x128xf32>
    %cst_38 = arith.constant 5.000000e-01 : f32
    %59 = vector.broadcast %cst_38 : f32 to vector<2x128xf32>
    %60 = arith.select %56, %59, %49 : vector<2x128xi1>, vector<2x128xf32>
    %61 = math.log %54 : vector<2x128xf32>
    %62 = arith.subf %57, %61 : vector<2x128xf32>
    %63 = arith.mulf %62, %60 : vector<2x128xf32>
    %64 = arith.divf %58, %54 : vector<2x128xf32>
    %cst_39 = arith.constant 1.000000e+00 : f32
    %65 = vector.broadcast %cst_39 : f32 to vector<2x128xf32>
    %66 = arith.subf %65, %64 : vector<2x128xf32>
    %67 = arith.mulf %66, %66 : vector<2x128xf32>
    %cst_40 = arith.constant 0.000000e+00 : f32
    %68 = vector.broadcast %cst_40 : f32 to vector<2x128xf32>
    %69 = arith.subf %68, %67 : vector<2x128xf32>
    %70 = arith.mulf %69, %63 : vector<2x128xf32>
    %c0_41 = arith.constant 0 : index
    %c0_42 = arith.constant 0 : index
    %c0_43 = arith.constant 0 : index
    %c0_44 = arith.constant 0 : index
    %71 = vector.load %arg4[%c0_41, %c0_42, %c0_43, %c0_44] : memref<1x1x2x128xf32, #tpu.memory_space<vmem>>, vector<1x1x2x128xf32>
    %72 = vector.shape_cast %71 : vector<1x1x2x128xf32> to vector<2x128xf32>
    %73 = vector.shape_cast %70 : vector<2x128xf32> to vector<1x1x2x128xf32>
    tpu.vector_store %arg4[%c0_41, %c0_42, %c0_43, %c0_44], %73 {strides = array<i32>} : memref<1x1x2x128xf32, #tpu.memory_space<vmem>>, vector<1x1x2x128xf32>,
    return
  }
  func.func @transform_0(%arg0: i32, %arg1: i32) -> (i32, i32, i32, i32) {
    %c0_i32 = arith.constant 0 : i32
    %c0_i32_0 = arith.constant 0 : i32
    %c0_i32_1 = arith.constant 0 : i32
    return %arg0, %c0_i32, %arg1, %c0_i32_0 : i32, i32, i32, i32
  }
  func.func @transform_1(%arg0: i32, %arg1: i32) -> (i32, i32, i32, i32) {
    %c0_i32 = arith.constant 0 : i32
    %c0_i32_0 = arith.constant 0 : i32
    %c0_i32_1 = arith.constant 0 : i32
    return %arg0, %c0_i32, %arg1, %c0_i32_0 : i32, i32, i32, i32
  }
  func.func @transform_2(%arg0: i32, %arg1: i32) -> (i32, i32, i32, i32) {
    %c0_i32 = arith.constant 0 : i32
    %c0_i32_0 = arith.constant 0 : i32
    %c0_i32_1 = arith.constant 0 : i32
    return %arg0, %arg1, %c0_i32, %c0_i32_0 : i32, i32, i32, i32
  }
}

</mosaic_0001>

<bundles_post_ra>
// kernel: tpu_custom_call.1
= control target key start
LH: loop header
LB: loop body
LE: loop exit
PB: predicated region body
PF: predicated region fallthrough
CT: control target
= control target key end

     0   :  { %7 = vsyncpa [#allocation3], 0  ;;  %s825_s0 = inlined_call_operand.hbm [shape: f32[2,4,2,128], index: 0, kind: input, shape index: {}]   ;;  %s826_s1 = inlined_call_operand.hbm [shape: s32[2,1,2,128], index: 1, kind: input, shape index: {}]   ;;  %s827_s2 = inlined_call_operand.hbm [shape: f32[2,1,2,128], index: 2, kind: output, shape index: {}]  }
   0x1   :  { %9 = vsyncpa [#allocation3 + $0x1], 0 }
   0x2   :  { %10 = vsyncpa [#allocation6], 0 }
   0x3   :  { %12 = vsyncpa [#allocation6 + $0x1], 0 }
   0x4   :  { %13 = vsyncpa [#allocation4], 0 }
   0x5   :  { %15 = vsyncpa [#allocation4 + $0x1], 0  ;;  %s659_s9 = smov 0   ;;  %s661_s10 = smov 0  }
   0x6   :  { %s663_s11 = smov 0   ;;  %s665_s12 = smov 0  }
   0x7   :  { %s667_s13 = smov 0   ;;  %s669_s14 = smov 0  }
   0x8 LB: > { %s393_s15 = sadd.s32 4294967295, %s636_s14   ;;  %s394_s16 = sadd.s32 4294967294, %s636_s14   ;;  %s636_s14 = sphi %s669_s14, %s21_s14   ;;  %s632_s13 = sphi %s667_s13, %s839_s13   ;;  %s628_s12 = sphi %s665_s12, %s838_s12   ;;  %s624_s11 = sphi %s663_s11, %s837_s11   ;;  %s620_s10 = sphi %s661_s10, %s836_s10   ;;  %s616_s9 = sphi %s659_s9, %s835_s9  }
   0x9   : > { %s33_s17 = sadd.s32 1, %s632_s13  ;;  %s42_s18 = sadd.s32 1, %s624_s11 }
   0xa   : > { %p35_p0 = scmp.ge.s32.totalorder %s33_s17, 2  ;;  %p49_p1 = scmp.ne.s32.totalorder %s624_s11, %s620_s10 }
   0xb   : > { %p50_p2 = scmp.eq.s32.totalorder %s636_s14, 0  ;;  %p55_p3 = scmp.ne.s32.totalorder %s620_s10, %s616_s9 }
   0xc   : > { %s841_s17 = smov (%p35_p0, %s33_s17), 0  ;;  %p56_p5 = scmp.eq.s32.totalorder %s393_s15, 0 }
   0xd   : > { %p700_p4 = por %p50_p2, %p49_p1  ;;  %s37_s20 = ssub.s32 %s632_s13, %s841_s17 }
   0xe   : > { %p109_p6 = scmp.eq.s32.totalorder %s393_s15, 1  ;;  %p40_p7 = scmp.eq.s32.totalorder %s37_s20, 0 }
   0xf   : > { %p706_p8 = por %p56_p5, %p55_p3  ;;  %p115_p10 = scmp.eq.s32.totalorder %s394_s16, 1 }
  0x10   : > { %p710_p9 = por %p109_p6, %p49_p1  ;;  %p431_p13 = scmp.lt.s32.totalorder %s636_s14, 2 }
  0x11   : > { %s715_s23 = scalar_select %p40_p7, %s624_s11, %s42_s18  }
  0x12   : > { %p717_p11 = por %p115_p10, %p55_p3  ;;  %s724_s25 = sand.u32 1, %s624_s11  }
  0x13   : > { %s397_s26 = sshll.u32 %s724_s25, 3  ;;  %s413_s27 = sshll.u32 %s632_s13, 7 }
  0x14   : > { %s146_s30 = scalar_lea.hbm %s825_s0, %s413_s27  ;;  %s139_s3 = scalar_lea.vmem [#allocation2], %s397_s26 }
  0x15   : > { %s147_s4 = sshll.u32 %s139_s3, 4  ;;  %p733_p0 = pnand %p431_p13, %p700_p4  ;;  %s148_s4 = int_to_ptr.vmem [resolvable:$true] %s147_s4 }
  0x16   : > { %p402_p1 = scmp.ge.s32.totalorder %s636_s14, 1  ;;  %s136_s6 = scalar_lea.sflag [#allocation3], %s724_s25 }
  0x17   : > { %p498_p2 = pneg %p733_p0  ;;  %s509_s7 = scalar_lea.vmem %s148_s4, 128 }
  0x18   : > { %p510_p3 = scmp.ne.s32.totalorder %s148_s4, %s509_s7  ;;  %s638_s8 = smov [#allocation2]  }
  0x19   : > { %s514_s15 = sshll.u32 %s638_s8, 4  ;;  %s515_s15 = int_to_ptr.vmem [resolvable:$false] %s514_s15 }
  0x1a   : > { %p512_p5 = pnand %p510_p3, %p498_p2  ;;  %s516_s16 = scalar_lea.vmem %s515_s15, 256 }
  0x1b   : > { %p517_p4 = scmp.lt.s32.totalorder %s148_s4, %s515_s15  ;;  %p518_p7 = scmp.lt.s32.totalorder %s516_s16, %s509_s7 }
  0x1c   : > { %p513_p6 = pneg %p512_p5 }
  0x1d   : > { %p519_p10 = por %p518_p7, %p517_p4 }
  0x1f   : > { %p520_p13 = pnand %p519_p10, %p513_p6 }
  0x21   : > { %523 = shalt.err (!%p520_p13)
}
  0x22   : > { %s639_s18 = smov 32   ;;  %s640_s19 = smov 2  }
  0x23   : > { %423 = dma.hbm_to_vmem [thread:$0]  (!%p733_p0), %s146_s30, 128, %s148_s4, %s136_s6, %s639_s18, %s639_s18, %s640_s19  }
  0x24   : > { %p174_p3 = scmp.lt.s32.totalorder %s636_s14, 3  ;;  %s400_s20 = sshll.u32 %s724_s25, 1 }
  0x25   : > { %s401_s26 = sshll.u32 %s632_s13, 5  ;;  %s161_s7 = scalar_lea.vmem [#allocation5], %s400_s20 }
  0x26   : > { %p751_p5 = pnand %p402_p1, %p174_p3  ;;  %s167_s3 = scalar_lea.hbm %s826_s1, %s401_s26 }
  0x27   : > { %s169_s8 = sshll.u32 %s161_s7, 4  ;;  %s158_s15 = scalar_lea.sflag [#allocation6], %s724_s25  ;;  %s170_s8 = int_to_ptr.vmem [resolvable:$true] %s169_s8 }
  0x28   : > { %s537_s16 = scalar_lea.vmem %s170_s8, 32  ;;  %s641_s30 = smov [#allocation5]  }
  0x29   : > { %p538_p6 = scmp.ne.s32.totalorder %s170_s8, %s537_s16  ;;  %s542_s4 = sshll.u32 %s641_s30, 4  ;;  %s543_s4 = int_to_ptr.vmem [resolvable:$false] %s542_s4 }
  0x2a   : > { %s544_s6 = scalar_lea.vmem %s543_s4, 64  ;;  %p545_p1 = scmp.lt.s32.totalorder %s170_s8, %s543_s4 }
  0x2b   : > { %p540_p4 = pnand %p538_p6, %p498_p2  ;;  %p546_p10 = scmp.lt.s32.totalorder %s544_s6, %s537_s16 }
  0x2d   : > { %p541_p7 = pneg %p540_p4  ;;  %p547_p13 = por %p546_p10, %p545_p1 }
  0x2f   : > { %p548_p3 = pnand %p547_p13, %p541_p7 }
  0x31   : > { %551 = shalt.err (!%p548_p3)
}
  0x32   : > { %426 = dma.hbm_to_vmem [thread:$0]  (!%p733_p0), %s167_s3, 32, %s170_s8, %s158_s15  }
  0x33   : > { %178 = sbr.rel (%p751_p5) target bundleno = 130 (0x82), region = 28  ;;  %s767_s25 = sand.u32 (!%p751_p5), 1, %s620_s10  }
  0x34   : > { %s403_s18 = sshll.u32 (!%p751_p5), %s767_s25, 3  ;;  %s181_s19 = scalar_lea.sflag (!%p751_p5), [#allocation3], %s767_s25 }
  0x35   : > { %s184_s20 = scalar_lea.vmem (!%p751_p5), [#allocation2], %s403_s18 }
  0x38   : > { %603 = dma.done.wait (%p706_p8), %s181_s19, 128  }
  0x39   : > { %605 = vsyncadd (%p706_p8), %s181_s19, 4294967168  ;;  %s404_s5 = sshll.u32 %s767_s25, 1  ;;  %s190_s26 = scalar_lea.sflag [#allocation6], %s767_s25 }
  0x3a   : > { %s193_s27 = scalar_lea.vmem [#allocation5], %s404_s5 }
  0x3b   : > { %607 = dma.done.wait (%p706_p8), %s190_s26, 32  }
  0x3c   : > { %609 = vsyncadd (%p706_p8), %s190_s26, 4294967264  ;;  %v220_v0 = vld [vmem:[%s184_s20] sm:$0x3]  ;;  %v406_v1 = vld [vmem:[%s184_s20 + $0x2] sm:$0x3]  ;;  %v642_v26 = vmov 0.0  }
  0x3d   : > { %v223_v2 = vmax.f32 %v220_v0, %v406_v1  ;;  %v407_v3 = vld [vmem:[%s184_s20 + $0x4] sm:$0x3]  ;;  %v408_v4 = vld [vmem:[%s184_s20 + $0x6] sm:$0x3]  ;;  %v219_v21 = vld [vmem:[%s193_s27] sm:$0x3] }
  0x3e   : > { %vm234_vm0 = vcmp.eq.s32.totalorder %v219_v21, 0  ;;  %vm242_vm1 = vcmp.eq.s32.totalorder %v219_v21, 1  ;;  %vm250_vm2 = vcmp.eq.s32.totalorder %v219_v21, 2  ;;  %vm258_vm3 = vcmp.eq.s32.totalorder %v219_v21, 3  ;;  %s218_s21 = scalar_lea.vmem [#allocation7], %s404_s5  ;;  %s410_s29 = sshll.u32 %s628_s12, 5 }
  0x3f   : > { %v226_v5 = vmax.f32 %v223_v2, %v407_v3  ;;  %v237_v27 = vsel %vm234_vm0, 0.25, %v642_v26  ;;  %s288_s28 = sshll.u32 %s218_s21, 4  ;;  %s286_s8 = scalar_lea.hbm %s827_s2, %s410_s29  ;;  %s289_s28 = int_to_ptr.vmem [resolvable:$true] %s288_s28 }
  0x40   : > { %v245_v30 = vsel %vm242_vm1, 0.75, %v237_v27  ;;  %s274_s15 = scalar_lea.sflag [#allocation4], %s767_s25  ;;  %s552_s16 = scalar_lea.vmem %s289_s28, 32 }
  0x41   : > { %v229_v6 = vmax.f32 %v226_v5, %v408_v4  ;;  %v253_v34 = vsel %vm250_vm2, 0.5, %v245_v30  ;;  %p553_p8 = scmp.ne.s32.totalorder %s289_s28, %s552_s16  ;;  %s643_s30 = smov [#allocation7]  }
  0x42   : > { %v261_v39 = vsel %vm258_vm3, 0.5, %v253_v34  ;;  %s556_s4 = sshll.u32 %s643_s30, 4  ;;  %s557_s4 = int_to_ptr.vmem [resolvable:$false] %s556_s4 }
  0x43   : > { %v230_v7 = vsub.f32 %v220_v0, %v229_v6  ;;  %v238_v8 = vsub.f32 %v406_v1, %v229_v6  ;;  %v246_v9 = vsub.f32 %v407_v3, %v229_v6  ;;  %v254_v10 = vsub.f32 %v408_v4, %v229_v6  ;;  %p554_p0 = pnand %p553_p8, %p710_p9  ;;  %s558_s6 = scalar_lea.vmem %s557_s4, 64 }
  0x44   : > { %p559_p5 = scmp.lt.s32.totalorder %s289_s28, %s557_s4  ;;  %p560_p6 = scmp.lt.s32.totalorder %s558_s6, %s552_s16 }
  0x45   : > { %v231_v11 = vmul.f32 1.442695, %v230_v7  ;;  %v239_v12 = vmul.f32 1.442695, %v238_v8  ;;  %v247_v13 = vmul.f32 1.442695, %v246_v9  ;;  %p555_p2 = pneg %p554_p0 }
  0x46   : > { %v255_v14 = vmul.f32 1.442695, %v254_v10  ;;  %v235_v24 = vsel %vm234_vm0, %v230_v7, 0.0  ;;  %p561_p4 = por %p560_p6, %p559_p5 }
  0x47   : > { %484 = vpow2.f32 %v231_v11  ;;  %v243_v28 = vsel %vm242_vm1, %v238_v8, %v235_v24 }
  0x48   : > { %486 = vpow2.f32 %v239_v12  ;;  %v251_v31 = vsel %vm250_vm2, %v246_v9, %v243_v28  ;;  %p562_p7 = pnand %p561_p4, %p555_p2 }
  0x49   : > { %488 = vpow2.f32 %v247_v13  ;;  %v259_v35 = vsel %vm258_vm3, %v254_v10, %v251_v31 }
  0x4a   : > { %490 = vpow2.f32 %v255_v14 }
  0x54   : > { %v485_v15 = vpop.eup %484 }
  0x55   : > { %v487_v16 = vpop.eup %486  ;;  %v236_v23 = vsel %vm234_vm0, %v485_v15, 0.0 }
  0x56   : > { %v489_v17 = vpop.eup %488  ;;  %v241_v18 = vadd.f32 %v487_v16, %v485_v15  ;;  %v244_v25 = vsel %vm242_vm1, %v487_v16, %v236_v23 }
  0x57   : > { %v491_v19 = vpop.eup %490  ;;  %v252_v29 = vsel %vm250_vm2, %v489_v17, %v244_v25 }
  0x58   : > { %v249_v20 = vadd.f32 %v489_v17, %v241_v18  ;;  %v260_v32 = vsel %vm258_vm3, %v491_v19, %v252_v29 }
  0x5a   : > { %v257_v22 = vadd.f32 %v491_v19, %v249_v20 }
  0x5c   : > { %492 = vlog2.f32 %v257_v22 }
  0x5d   : > { %494 = vrcp.f32 %v257_v22 }
  0x69   : > { %v493_v33 = vpop.eup %492 }
  0x6a   : > { %v495_v36 = vpop.eup %494  ;;  %v263_v37 = vmul.f32 0.6931472, %v493_v33 }
  0x6b   : > { %v267_v38 = vmul.f32 %v495_v36, %v260_v32 }
  0x6c   : > { %v264_v40 = vsub.f32 %v259_v35, %v263_v37 }
  0x6d   : > { %v268_v41 = vsub.f32 1.0, %v267_v38 }
  0x6e   : > { %v265_v42 = vmul.f32 %v264_v40, %v261_v39 }
  0x6f   : > { %v269_v43 = vmul.f32 %v268_v41, %v268_v41 }
  0x71   : > { %v270_v44 = vsub.f32 0.0, %v269_v43 }
  0x73   : > { %v271_v45 = vmul.f32 %v270_v44, %v265_v42 }
  0x75   : > { %272 = vst [vmem:[%s218_s21] sm:$0x3] %v271_v45 }
  0x76   : > { %565 = shalt.err (!%p562_p7)
}
  0x77   : > { %s566_s12 = scalar_lea.hbm %s286_s8, 32  ;;  %s570_s19 = scalar_lea.hbm %s827_s2, 64 }
  0x78   : > { %p567_p1 = scmp.ne.s32.totalorder %s286_s8, %s566_s12  ;;  %p571_p3 = scmp.lt.s32.totalorder %s286_s8, %s827_s2 }
  0x79   : > { %p572_p8 = scmp.lt.s32.totalorder %s570_s19, %s566_s12 }
  0x7a   : > { %p568_p10 = pnand %p567_p1, %p710_p9 }
  0x7b   : > { %p573_p0 = por %p572_p8, %p571_p3 }
  0x7c   : > { %p569_p13 = pneg %p568_p10 }
  0x7e   : > { %p574_p12 = pnand %p573_p0, %p569_p13 }
  0x80   : > { %577 = shalt.err (!%p574_p12)
}
  0x81   : > { %418 = dma.vmem_to_hbm [thread:$0]  (%p710_p9), %s289_s28, 32, %s286_s8, %s274_s15  }
  0x82 PF: > { %s300_s26 = sand.u32 1, %s616_s9   ;;  %p834_p2 = scmp.ge.s32.totalorder %s636_s14, 2 }
  0x83   : > { %s301_s27 = scalar_lea.sflag [#allocation4], %s300_s26 }
  0x84   : > { %p428_p5 = pnand %p834_p2, %p717_p11 }
  0x86   : > { %p429_p6 = pneg %p428_p5 }
  0x88   : > { %611 = dma.done.wait (%p429_p6), %s301_s27, 32  }
  0x89   : > { %613 = vsyncadd (%p429_p6), %s301_s27, 4294967264  ;;  %s21_s14 = sadd.s32 1, %s636_s14   ;;  %s835_s9 = smov %s620_s10 }
  0x8a   : > { %p18_p4 = scmp.ge.s32.totalorder %s21_s14, 4   ;;  %s836_s10 = smov %s624_s11 }
  0x8b   : > { %s837_s11 = smov %s715_s23  ;;  %s838_s12 = smov %s632_s13 }
  0x8c   : > { %s839_s13 = smov %s841_s17  ;;  %20 = sbr.rel (!%p18_p4) target bundleno = 8 (0x8), region = 89 }
  0x91   :  { %306 = vsyncpa [#allocation3], 1 }
  0x92   :  { %308 = vsyncpa [#allocation3 + $0x1], 1 }
  0x93   :  { %309 = vsyncpa [#allocation6], 1 }
  0x94   :  { %311 = vsyncpa [#allocation6 + $0x1], 1 }
  0x95   :  { %312 = vsyncpa [#allocation4], 1 }
  0x96   :  { %314 = vsyncpa [#allocation4 + $0x1], 1 }

</bundles_post_ra>
